<compile_context>
chip_gen: v7x
topology: tpu7x:2x2x1
jax: 0.10.0
libtpu: 0.0.40
codegen_flags: <defaults>
</compile_context>

<pallas_src>
import numpy as np
import jax
import jax.numpy as jnp
from jax.experimental import pallas as pl
from jax.experimental.pallas import tpu as pltpu

_LANE = 128
_SUB = 8


def make_sinusoidal_pos_attn(seq_len: int, d_model: int) -> jnp.ndarray:
    """Deterministic cached 'positional attention' table of shape [L, d_model]."""
    position = np.arange(seq_len, dtype=np.float32)[:, None]            # [L, 1]
    div_term = np.exp(
        np.arange(0, d_model, 2, dtype=np.float32) * (-np.log(10000.0) / d_model)
    )                                                                    # [D/2]
    pe = np.zeros((seq_len, d_model), dtype=np.float32)
    pe[:, 0::2] = np.sin(position * div_term)
    pe[:, 1::2] = np.cos(position * div_term)
    return jnp.asarray(pe)


def _bcast_kernel(p_ref, o_ref):
    # p_ref: (1, TR)  lane-dense chunk of the cached table (block index constant
    #                 across the batch grid axis -> reused, not re-DMA'd).
    # o_ref: (TB, TR) lane-dense output slab covering TB batch rows.
    o_ref[...] = jnp.broadcast_to(p_ref[...], o_ref.shape)


def _chip_params():
    """(max_block_bytes, two_tc, vmem_limit_cap_bytes) with safe fallbacks."""
    max_block = 4 << 20      # conservative default (unknown part)
    two_tc = False
    vmem_cap = 48 << 20      # conservative vmem_limit ceiling

    kind = ""
    try:
        kind = jax.devices()[0].device_kind.lower()
    except Exception:
        pass

    if ("v5e" in kind) or ("v5 lite" in kind) or ("v5litepod" in kind):
        # v5e: 1 TC, 128 MiB VMEM, ~0.82 TB/s HBM -> 8 MiB blocks ~97% roofline.
        max_block, two_tc, vmem_cap = 8 << 20, False, 100 << 20
    elif "v6" in kind:
        # v6e: 1 TC, 128 MiB VMEM, ~1.4 TB/s HBM -> 8 MiB blocks ~95% roofline.
        max_block, two_tc, vmem_cap = 8 << 20, False, 100 << 20
    elif ("7x" in kind) or ("v7" in kind):
        # v7x: 2 TC/chip, 64 MiB VMEM/TC, ~3.2 TB/s HBM -> bigger blocks needed
        # to amortize the fixed per-step overhead; keep DB'd blocks under VMEM.
        max_block, two_tc, vmem_cap = 12 << 20, True, 56 << 20
    elif ("v5p" in kind) or ("v4" in kind):
        # Megacore parts: 2 TCs share "parallel" grid axes.
        max_block, two_tc, vmem_cap = 8 << 20, True, 100 << 20

    # Refine the VMEM ceiling from the hardware query when available.
    try:
        info = pltpu.get_tpu_info()
        phys = int(info.vmem_capacity_bytes)
        if phys > (16 << 20):
            vmem_cap = min(vmem_cap, phys - (8 << 20))
    except Exception:
        pass
    return max_block, two_tc, vmem_cap


def _choose_tiles(B: int, row: int, itemsize: int, max_block_bytes: int,
                  two_tc: bool):
    """Pick (TB, TR) for blocks of a [B, row] output, honoring the (8,128) rule."""
    row_bytes = row * itemsize
    # Smallest legal batch tile: the full batch if B < 8, else 8 (block
    # second-to-last dim must be a multiple of 8 or equal the full dim).
    min_tb = B if B < _SUB else _SUB

    # Lane (last-dim) tile: full row if min_tb rows fit the budget, else a
    # 128-multiple chunk sized so min_tb rows fit.
    if min_tb * row_bytes <= max_block_bytes:
        tr = row
    else:
        tr = max(_LANE, (max_block_bytes // (min_tb * itemsize * _LANE)) * _LANE)
        tr = min(tr, row)
    tr_bytes = tr * itemsize

    # Batch (sublane) tile: as many rows as fit the budget.
    tb = max(min_tb, min(B, max_block_bytes // max(1, tr_bytes)))
    # Only shrink the batch tile on 2-TC parts (the grid is a serial loop on
    # single-TC chips, so splitting there is pure per-step overhead).
    if two_tc and B >= 2:
        tb = max(min_tb, min(tb, -(-B // 2)))
    if tb != B and tb % _SUB != 0:
        tb = max(min_tb, (tb // _SUB) * _SUB)
    tb = max(1, min(tb, B))

    # On 2-TC parts, guarantee >= 2 grid steps on a parallel axis: if the batch
    # axis ended up with a single block, split the lane axis in 128-multiples.
    nb = -(-B // tb)
    nr = -(-row // tr)
    if two_tc and nb * nr < 2 and row > _LANE:
        lane_blocks = -(-row // _LANE)
        tr = min(tr, (-(-lane_blocks // 2)) * _LANE)
    return tb, tr


def positional_att_cached(x: jnp.ndarray, pos_attns: dict) -> jnp.ndarray:
    """Pallas equivalent of PositionalAttCached.forward.

    x: [B, L, D] (only the shape is used).
    pos_attns: dict mapping sequence length -> [L, d_model] cached table.
    Returns: [B, L, d_model] = pos_attns[L] repeated over the batch axis.
    """
    B, L = int(x.shape[0]), int(x.shape[1])
    pos_attn = pos_attns[L]                      # [L, d_model]
    Lp, D = pos_attn.shape
    assert Lp == L

    dtype = pos_attn.dtype
    itemsize = jnp.dtype(dtype).itemsize
    row = L * D                                   # lane-dense flattened row

    max_block_bytes, two_tc, vmem_cap = _chip_params()
    tb, tr = _choose_tiles(B, row, itemsize, max_block_bytes, two_tc)
    nb = pl.cdiv(B, tb)
    nr = pl.cdiv(row, tr)

    # Explicit VMEM sizing: double-buffered output block + double-buffered input
    # chunk, plus headroom; capped below the generation's physical VMEM.
    vmem_need = 2 * (tb + 1) * tr * itemsize
    vmem_limit = int(min(vmem_cap, max(vmem_need + (4 << 20), 16 << 20)))

    p2d = pos_attn.reshape(1, row)                # lane-dense table, 1 sublane row

    out2d = pl.pallas_call(
        _bcast_kernel,
        out_shape=jax.ShapeDtypeStruct((B, row), dtype),
        # Row-chunk axis outermost so the table chunk is reused (no re-DMA)
        # across the inner batch-tile loop.  No reduction axis -> both parallel.
        grid=(nr, nb),
        in_specs=[
            pl.BlockSpec((1, tr), lambda r, b: (0, r)),
        ],
        out_specs=pl.BlockSpec((tb, tr), lambda r, b: (b, r)),
        compiler_params=pltpu.CompilerParams(
            dimension_semantics=("parallel", "parallel"),
            vmem_limit_bytes=vmem_limit,
        ),
        cost_estimate=pl.CostEstimate(
            flops=0,
            transcendentals=0,
            bytes_accessed=(B * row + row) * itemsize,
        ),
    )(p2d)

    return out2d.reshape(B, L, D)


class PositionalAttCachedPallas:
    """Thin wrapper mirroring the PyTorch module's interface."""

    def __init__(self, d_model, pos_attns, max_len=5000):
        self.d_model = d_model
        self.pos_attns = pos_attns
        self.max_len = max_len

    def __call__(self, x):
        # TODO(synk): `.cuda()` in the reference is device placement only; arrays
        # are already resident on the TPU backend, so it has no Pallas analogue.
        return positional_att_cached(x, self.pos_attns)


if __name__ == "__main__":
    # Small shapes consistent with the module's forward.
    B, L, D = 2, 8, 32

    key = jax.random.PRNGKey(0)
    x = jax.random.normal(key, (B, L, D), dtype=jnp.float32)

    # Deterministic cached positional-attention tables (keyed by seq length).
    pos_attns = {L: make_sinusoidal_pos_attn(L, D)}

    module = PositionalAttCachedPallas(d_model=D, pos_attns=pos_attns)
    out = module(x)
    out = jax.block_until_ready(out)

    # Reference check: output must equal the table tiled over batch.
    ref = jnp.broadcast_to(pos_attns[L][None, :, :], (B, L, D))
    assert out.shape == (B, L, D)
    np.testing.assert_allclose(np.asarray(out), np.asarray(ref), rtol=0, atol=0)

    print("KERNEL_OK")
</pallas_src>

<mosaic_0001>
module attributes {stable_mosaic.version = 11 : i64} {
  func.func @_bcast_kernel(%arg0: i32, %arg1: i32, %arg2: memref<1x256xf32, #tpu.memory_space<vmem>>, %arg3: memref<2x256xf32, #tpu.memory_space<vmem>>) attributes {dimension_semantics = [#tpu.dimension_semantics<parallel>, #tpu.dimension_semantics<parallel>], iteration_bounds = array<i64: 1, 1>, scalar_prefetch = 0 : i64, scratch_operands = 0 : i64, tpu.core_type = #tpu.core_type<tc>, window_params = [{transform_indices = @transform_0, window_bounds = array<i64: 1, 256>}, {transform_indices = @transform_1, window_bounds = array<i64: 2, 256>}]} {
    %c0 = arith.constant 0 : index
    %c0_0 = arith.constant 0 : index
    %0 = vector.load %arg2[%c0, %c0_0] : memref<1x256xf32, #tpu.memory_space<vmem>>, vector<1x256xf32>
    %1 = vector.shape_cast %0 : vector<1x256xf32> to vector<1x256xf32>
    %2 = vector.broadcast %1 : vector<1x256xf32> to vector<2x256xf32>
    %c0_1 = arith.constant 0 : index
    %c0_2 = arith.constant 0 : index
    %3 = vector.load %arg3[%c0_1, %c0_2] : memref<2x256xf32, #tpu.memory_space<vmem>>, vector<2x256xf32>
    tpu.vector_store %arg3[%c0_1, %c0_2], %2 {strides = array<i32>} : memref<2x256xf32, #tpu.memory_space<vmem>>, vector<2x256xf32>,
    return
  }
  func.func @transform_0(%arg0: i32, %arg1: i32) -> (i32, i32) {
    %c0_i32 = arith.constant 0 : i32
    %c0_i32_0 = arith.constant 0 : i32
    return %c0_i32, %arg0 : i32, i32
  }
  func.func @transform_1(%arg0: i32, %arg1: i32) -> (i32, i32) {
    %c0_i32 = arith.constant 0 : i32
    return %arg1, %arg0 : i32, i32
  }
}

</mosaic_0001>

<bundles_post_ra>
// kernel: tpu_custom_call.1
= control target key start
LH: loop header
LB: loop body
LE: loop exit
PB: predicated region body
PF: predicated region fallthrough
CT: control target
= control target key end

     0   :  { %6 = vsyncpa [#allocation3], 0  ;;  %s143_s0 = inlined_call_operand.hbm [shape: f32[1,256], index: 0, kind: input, shape index: {}]   ;;  %s144_s1 = inlined_call_operand.hbm [shape: f32[2,256], index: 1, kind: output, shape index: {}]  }
   0x1   :  { %7 = vsyncpa [#allocation4], 0  ;;  %s107_s6 = smov [#allocation2]   ;;  %s59_s10 = scalar_lea.hbm %s143_s0, 32 }
   0x2   :  { %s14_s7 = sshll.u32 %s107_s6, 4  ;;  %p60_p0 = scmp.ne.s32.totalorder %s143_s0, %s59_s10  ;;  %s15_s7 = int_to_ptr.vmem [resolvable:$true] %s14_s7 }
   0x3   :  { %p63_p1 = scmp.lt.u32.totalorder %s59_s10, %s143_s0 }
   0x5   :  { %p65_p2 = pnand %p63_p1, %p60_p0 }
   0x7   :  { %68 = shalt.err (!%p65_p2)
}
   0x8   :  { %s69_s15 = scalar_lea.vmem %s15_s7, 32  ;;  %p74_p4 = scmp.lt.s32.totalorder %s15_s7, %s15_s7 }
   0x9   :  { %p70_p3 = scmp.ne.s32.totalorder %s15_s7, %s69_s15  ;;  %p75_p5 = scmp.lt.s32.totalorder %s69_s15, %s69_s15 }
   0xb   :  { %p76_p6 = por %p75_p5, %p74_p4 }
   0xd   :  { %p77_p7 = pnand %p76_p6, %p70_p3 }
   0xf   :  { %80 = shalt.err (!%p77_p7)
}
  0x10   :  { %17 = dma.hbm_to_vmem [thread:$0]  %s143_s0, 32, %s15_s7, [#allocation3]  }
  0x11   :  { %103 = dma.done.wait [#allocation3], 32  }
  0x12   :  { %104 = vsyncadd [#allocation3], 4294967264  ;;  %v23_v0 = vlaneseq  ;;  %v21_v4 = vld [vmem:[#allocation2] sm:$0x3]  ;;  %s108_s18 = smov [#allocation5]  }
  0x13   :  { %s47_s19 = sshll.u32 %s108_s18, 4  ;;  %s48_s19 = int_to_ptr.vmem [resolvable:$true] %s47_s19 }
  0x14   :  { %v24_v1 = vshrl.u32 %v23_v0, 7  ;;  %s81_s20 = scalar_lea.vmem %s48_s19, 64  ;;  %p86_p9 = scmp.lt.s32.totalorder %s48_s19, %s48_s19 }
  0x15   :  { %p82_p8 = scmp.ne.s32.totalorder %s48_s19, %s81_s20  ;;  %p87_p10 = scmp.lt.s32.totalorder %s81_s20, %s81_s20 }
  0x16   :  { %v25_v2 = vsub.s32 0, %v24_v1  ;;  %v29_v3 = vsub.s32 1, %v24_v1 }
  0x17   :  { %p88_p11 = por %p87_p10, %p86_p9 }
  0x18   :  { %v26_v5 = vrot.slane %v21_v4, %v25_v2  ;;  %v30_v6 = vrot.slane %v21_v4, %v29_v3 }
  0x19   :  { %p89_p12 = pnand %p88_p11, %p82_p8 }
  0x1a   :  { %v31_v7 = vcombine.low %v26_v5, %v30_v6 }
  0x1c   :  { %56 = vst.sshfl [vmem:[#allocation5] sm:$0x33 pattern:$0x76325410] %v31_v7 }
  0x1d   :  { %92 = shalt.err (!%p89_p12)
}
  0x1e   :  { %s93_s22 = scalar_lea.hbm %s144_s1, 64 }
  0x1f   :  { %p94_p13 = scmp.ne.s32.totalorder %s144_s1, %s93_s22  ;;  %p97_p0 = scmp.lt.u32.totalorder %s93_s22, %s144_s1 }
  0x21   :  { %p99_p1 = pnand %p97_p0, %p94_p13 }
  0x23   :  { %102 = shalt.err (!%p99_p1)
}
  0x24   :  { %50 = dma.vmem_to_hbm [thread:$0]  %s48_s19, 64, %s144_s1, [#allocation4]  }
  0x25   :  { %105 = dma.done.wait [#allocation4], 64  }
  0x26   :  { %106 = vsyncadd [#allocation4], 4294967232 }
  0x27   :  { %54 = vsyncpa [#allocation3], 1 }
  0x28   :  { %55 = vsyncpa [#allocation4], 1 }

</bundles_post_ra>
